<compile_context>
chip_gen: v5e
topology: v5e:2x2
jax: 0.10.0
libtpu: 0.0.40
codegen_flags: <defaults>
</compile_context>

<pallas_src>
import functools

import jax
import jax.numpy as jnp
from jax.experimental import pallas as pl
from jax.experimental.pallas import tpu as pltpu

EPSILON = 1e-6  # BaseKernel.__init__(epsilon=1e-06)


def _gram_tile_kernel(xi_ref, xj_ref, k_ref, *, epsilon, use_bf16_mxu):
    """One (TILE, TILE) tile of K = x x^T (+ epsilon*I on diagonal tiles)."""
    xi = xi_ref[...]
    xj = xj_ref[...]
    if use_bf16_mxu:
        # Feed the MXU bf16 operands (v6e/v7x peak rates), accumulate in f32.
        xi = xi.astype(jnp.bfloat16)
        xj = xj.astype(jnp.bfloat16)

    # Contract over the feature axis of both operands directly -- avoids
    # materializing xj.T (XLU transpose + VMEM tile copy) before the MXU.
    gram = jax.lax.dot_general(
        xi, xj,
        dimension_numbers=(((1,), (1,)), ((), ())),
        preferred_element_type=jnp.float32,
    )
    k_ref[...] = gram.astype(k_ref.dtype)

    # Epsilon jitter only touches diagonal output tiles (program_id(0)==(1));
    # off-diagonal tiles skip the iota/compare/FMA epilogue entirely.
    @pl.when(pl.program_id(0) == pl.program_id(1))
    def _():
        tm, tn = k_ref.shape
        row = jax.lax.broadcasted_iota(jnp.int32, (tm, tn), 0)
        col = jax.lax.broadcasted_iota(jnp.int32, (tm, tn), 1)
        eye = (row == col).astype(k_ref.dtype)
        k_ref[...] = k_ref[...] + jnp.asarray(epsilon, k_ref.dtype) * eye


def _round_up(v, m):
    return ((v + m - 1) // m) * m


def _pick_tile(n):
    # Tiles <= 512 keep double-buffered panels + output well inside the
    # scoped-VMEM budget on all of v5e / v6e / v7x while amortizing the
    # ~0.35us per-grid-step overhead.
    for t in (512, 256, 128):
        if n >= t:
            return t
    return 128


def base_kernel_forward(x, *, epsilon=EPSILON, tile=None, use_bf16_mxu=False):
    """x: [N, D] float -> K = x @ x.T + epsilon*I, [N, N] float32."""
    n, d = x.shape
    if tile is None:
        tile = _pick_tile(n)

    # Host-side padding: N to the tile size, D to a lane multiple (128).
    # Zero-padded rows/features contribute 0 to the Gram matrix; padded
    # diagonal entries only pick up epsilon and are sliced away below.
    n_pad = _round_up(n, tile)
    d_pad = _round_up(d, 128)
    if (n_pad, d_pad) != (n, d):
        x = jnp.pad(x, ((0, n_pad - n), (0, d_pad - d)))
    x = x.astype(jnp.float32)

    grid = (n_pad // tile, n_pad // tile)

    # Double-buffered: two (tile, d_pad) input panels + one (tile, tile) output
    # tile, x2 buffers each, plus headroom.  Capped well under v7x's 64 MiB.
    per_step = 2 * tile * d_pad * 4 + tile * tile * 4
    vmem_limit = int(min(max(32 * 1024 * 1024, 3 * per_step), 60 * 1024 * 1024))

    kernel = functools.partial(
        _gram_tile_kernel, epsilon=float(epsilon), use_bf16_mxu=use_bf16_mxu)

    k_pad = pl.pallas_call(
        kernel,
        out_shape=jax.ShapeDtypeStruct((n_pad, n_pad), jnp.float32),
        grid=grid,
        in_specs=[
            pl.BlockSpec((tile, d_pad), lambda i, j: (i, 0)),  # row panel i
            pl.BlockSpec((tile, d_pad), lambda i, j: (j, 0)),  # row panel j
        ],
        out_specs=pl.BlockSpec((tile, tile), lambda i, j: (i, j)),
        compiler_params=pltpu.CompilerParams(
            dimension_semantics=("parallel", "parallel"),
            vmem_limit_bytes=vmem_limit,
        ),
    )(x, x)

    if n_pad != n:
        k_pad = k_pad[:n, :n]
    return k_pad


if __name__ == "__main__":
    key = jax.random.PRNGKey(0)
    # Small GP-style input: 256 samples, 32 features (D padded to 128 on host,
    # N tiled into a 2x2 grid of 128x128 output tiles -> exercises off-diagonal
    # tiles skipping the epsilon add and diagonal tiles applying it).
    n, d = 256, 32
    x = jax.random.normal(key, (n, d), dtype=jnp.float32)

    k = base_kernel_forward(x)
    jax.block_until_ready(k)

    # Sanity check against plain JAX reference.
    k_ref = x @ x.T + EPSILON * jnp.eye(n, dtype=jnp.float32)
    assert k.shape == (n, n)
    assert jnp.allclose(k, k_ref, atol=1e-4, rtol=1e-4)

    print("KERNEL_OK")
</pallas_src>

<mosaic_0001>
module attributes {stable_mosaic.version = 11 : i64} {
  func.func @_gram_tile_kernel(%arg0: i32, %arg1: i32, %arg2: memref<256x128xf32, #tpu.memory_space<vmem>>, %arg3: memref<256x128xf32, #tpu.memory_space<vmem>>, %arg4: memref<256x256xf32, #tpu.memory_space<vmem>>) attributes {dimension_semantics = [#tpu.dimension_semantics<parallel>, #tpu.dimension_semantics<parallel>], iteration_bounds = array<i64: 1, 1>, scalar_prefetch = 0 : i64, scratch_operands = 0 : i64, tpu.core_type = #tpu.core_type<tc>, window_params = [{transform_indices = @transform_0, window_bounds = array<i64: 256, 128>}, {transform_indices = @transform_1, window_bounds = array<i64: 256, 128>}, {transform_indices = @transform_2, window_bounds = array<i64: 256, 256>}]} {
    %c0 = arith.constant 0 : index
    %c0_0 = arith.constant 0 : index
    %0 = vector.load %arg2[%c0, %c0_0] : memref<256x128xf32, #tpu.memory_space<vmem>>, vector<256x128xf32>
    %c0_1 = arith.constant 0 : index
    %c0_2 = arith.constant 0 : index
    %1 = vector.load %arg3[%c0_1, %c0_2] : memref<256x128xf32, #tpu.memory_space<vmem>>, vector<256x128xf32>
    %cst = arith.constant dense<0.000000e+00> : vector<256x256xf32>
    %2 = tpu.matmul %0, %1, %cst {dimension_numbers = #tpu.dot_dimension_numbers<[1], [1], [0], [0], [0, 0, 1, 0], [], []>} : vector<256x128xf32>, vector<256x128xf32>, vector<256x256xf32> -> vector<256x256xf32>
    %c0_3 = arith.constant 0 : index
    %c0_4 = arith.constant 0 : index
    %3 = vector.load %arg4[%c0_3, %c0_4] : memref<256x256xf32, #tpu.memory_space<vmem>>, vector<256x256xf32>
    tpu.vector_store %arg4[%c0_3, %c0_4], %2 {strides = array<i32>} : memref<256x256xf32, #tpu.memory_space<vmem>>, vector<256x256xf32>,
    %4 = arith.cmpi eq, %arg0, %arg1 : i32
    %5 = arith.extui %4 : i1 to i32
    %c0_i32 = arith.constant 0 : i32
    %6 = arith.cmpi ne, %5, %c0_i32 : i32
    scf.if %6 {
      %7 = tpu.iota {dimensions = array<i32: 0>} : vector<256x256xi32>
      %8 = tpu.iota {dimensions = array<i32: 1>} : vector<256x256xi32>
      %9 = arith.cmpi eq, %7, %8 : vector<256x256xi32>
      %10 = arith.extui %9 : vector<256x256xi1> to vector<256x256xi32>
      %11 = arith.sitofp %10 : vector<256x256xi32> to vector<256x256xf32>
      %c0_5 = arith.constant 0 : index
      %c0_6 = arith.constant 0 : index
      %12 = vector.load %arg4[%c0_5, %c0_6] : memref<256x256xf32, #tpu.memory_space<vmem>>, vector<256x256xf32>
      %cst_7 = arith.constant 9.99999997E-7 : f32
      %13 = vector.broadcast %cst_7 : f32 to vector<256x256xf32>
      %14 = arith.mulf %13, %11 : vector<256x256xf32>
      %15 = arith.addf %12, %14 : vector<256x256xf32>
      %c0_8 = arith.constant 0 : index
      %c0_9 = arith.constant 0 : index
      %16 = vector.load %arg4[%c0_8, %c0_9] : memref<256x256xf32, #tpu.memory_space<vmem>>, vector<256x256xf32>
      tpu.vector_store %arg4[%c0_8, %c0_9], %15 {strides = array<i32>} : memref<256x256xf32, #tpu.memory_space<vmem>>, vector<256x256xf32>,
    } else {
    }
    return
  }
  func.func @transform_0(%arg0: i32, %arg1: i32) -> (i32, i32) {
    %c0_i32 = arith.constant 0 : i32
    %c0_i32_0 = arith.constant 0 : i32
    return %arg0, %c0_i32 : i32, i32
  }
  func.func @transform_1(%arg0: i32, %arg1: i32) -> (i32, i32) {
    %c0_i32 = arith.constant 0 : i32
    %c0_i32_0 = arith.constant 0 : i32
    return %arg1, %c0_i32 : i32, i32
  }
  func.func @transform_2(%arg0: i32, %arg1: i32) -> (i32, i32) {
    %c0_i32 = arith.constant 0 : i32
    return %arg0, %arg1 : i32, i32
  }
}

</mosaic_0001>

<bundles_post_ra>
// kernel: tpu_custom_call.1
= control target key start
LH: loop header
LB: loop body
LE: loop exit
PB: predicated region body
PF: predicated region fallthrough
CT: control target
= control target key end

     0   :  { %7 = vsyncpa [#allocation3], 0  ;;  %s1191_s0 = inlined_call_operand.hbm [shape: f32[256,128], index: 0, kind: input, shape index: {}]   ;;  %s1192_s1 = inlined_call_operand.hbm [shape: f32[256,128], index: 1, kind: input, shape index: {}]   ;;  %s1193_s2 = inlined_call_operand.hbm [shape: f32[256,256], index: 2, kind: output, shape index: {}]  }
   0x1   :  { %8 = vsyncpa [#allocation6], 0 }
   0x2   :  { %9 = vsyncpa [#allocation4], 0  ;;  %s14_s11 = sshll.u32 %s1191_s0, 4  ;;  %s1056_s12 = smov [#allocation2]   ;;  %s15_s11 = int_to_ptr.hbm [resolvable:$true] %s14_s11 }
   0x3   :  { %s16_s13 = sshll.u32 %s1056_s12, 4  ;;  %s27_s16 = sshll.u32 %s1192_s1, 4  ;;  %s17_s13 = int_to_ptr.vmem [resolvable:$true] %s16_s13  ;;  %s28_s16 = int_to_ptr.hbm [resolvable:$true] %s27_s16 }
   0x4   :  { %s1057_s17 = smov 128   ;;  %s1058_s18 = smov 8  }
   0x5   :  { %22 = dma.hbm_to_vmem [thread:$0]  %s15_s11, 4096, %s17_s13, [#allocation3], %s1057_s17, %s1057_s17, %s1058_s18  }
   0x6   :  { %s1059_s19 = smov [#allocation5]  }
   0x7   :  { %s29_s20 = sshll.u32 %s1059_s19, 4  ;;  %s30_s20 = int_to_ptr.vmem [resolvable:$true] %s29_s20 }
   0x8   :  { %35 = dma.hbm_to_vmem [thread:$0]  %s28_s16, 4096, %s30_s20, [#allocation6], %s1057_s17, %s1057_s17, %s1058_s18  }
   0x9   :  { %1050 = dma.done.wait [#allocation3], 4096  }
   0xa   :  { %1051 = vsyncadd [#allocation3], 4294963200 }
   0xb   :  { %1052 = dma.done.wait [#allocation6], 4096  }
   0xc   :  { %1053 = vsyncadd [#allocation6], 4294963200  ;;  %v107_v0 = vld [vmem:[#allocation5 + $0xf8] sm:$0xff]  ;;  %v106_v2 = vld [vmem:[#allocation5 + $0xf0] sm:$0xff]  ;;  %v402_v62 = vlaneseq  ;;  %s1061_s0 = smov [#allocation7]   ;;  %s892_s23 = sshll.u32 %s1193_s2, 4  ;;  %s893_s23 = int_to_ptr.hbm [resolvable:$true] %s892_s23 }
   0xd   :  { %v91_v1 = vld [vmem:[#allocation5 + $0x78] sm:$0xff]  ;;  %954 = vmatpush.xpose.msra.mxu3 %v107_v0  ;;  %v90_v3 = vld [vmem:[#allocation5 + $0x70] sm:$0xff]  ;;  %221 = vmatpush.xpose.msra.mxu1 %v107_v0  ;;  %v105_v4 = vld [vmem:[#allocation5 + $0xe8] sm:$0xff]  ;;  %s890_s1 = sshll.u32 %s1061_s0, 4  ;;  %s1062_s24 = smov 256   ;;  %s891_s1 = int_to_ptr.vmem [resolvable:$true] %s890_s1 }
   0xe   :  { %938 = vmatpush.xpose.msra.mxu2 %v91_v1  ;;  %108 = vmatpush.xpose.msra.mxu0 %v91_v1  ;;  %v89_v5 = vld [vmem:[#allocation5 + $0x68] sm:$0xff]  ;;  %v104_v6 = vld [vmem:[#allocation5 + $0xe0] sm:$0xff]  ;;  %v103_v8 = vld [vmem:[#allocation5 + $0xd8] sm:$0xff]  ;;  %v1085_v63 = vshrl.u32 %v402_v62, 7  ;;  %v1087_v0 = vand.u32 127, %v402_v62  ;;  %s1063_s25 = smov 16  }
   0xf   :  { %v88_v7 = vld [vmem:[#allocation5 + $0x60] sm:$0xff]  ;;  %v87_v9 = vld [vmem:[#allocation5 + $0x58] sm:$0xff]  ;;  %v102_v10 = vld [vmem:[#allocation5 + $0xd0] sm:$0xff] }
  0x10   :  { %v86_v11 = vld [vmem:[#allocation5 + $0x50] sm:$0xff]  ;;  %v101_v12 = vld [vmem:[#allocation5 + $0xc8] sm:$0xff]  ;;  %v100_v14 = vld [vmem:[#allocation5 + $0xc0] sm:$0xff]  ;;  %vm438_vm0 = vcmp.eq.s32.totalorder %v1085_v63, %v1087_v0 }
  0x11   :  { %955 = vmatpush.xpose.msra.mxu3 %v106_v2  ;;  %222 = vmatpush.xpose.msra.mxu1 %v106_v2  ;;  %v85_v13 = vld [vmem:[#allocation5 + $0x48] sm:$0xff]  ;;  %v84_v15 = vld [vmem:[#allocation5 + $0x40] sm:$0xff]  ;;  %v99_v16 = vld [vmem:[#allocation5 + $0xb8] sm:$0xff] }
  0x12   :  { %939 = vmatpush.xpose.msra.mxu2 %v90_v3  ;;  %109 = vmatpush.xpose.msra.mxu0 %v90_v3  ;;  %v83_v17 = vld [vmem:[#allocation5 + $0x38] sm:$0xff]  ;;  %v98_v18 = vld [vmem:[#allocation5 + $0xb0] sm:$0xff]  ;;  %v97_v20 = vld [vmem:[#allocation5 + $0xa8] sm:$0xff]  ;;  %v419_v3 = vadd.s32 128, %v1085_v63 }
  0x13   :  { %v82_v19 = vld [vmem:[#allocation5 + $0x30] sm:$0xff]  ;;  %v81_v21 = vld [vmem:[#allocation5 + $0x28] sm:$0xff]  ;;  %v96_v22 = vld [vmem:[#allocation5 + $0xa0] sm:$0xff] }
  0x14   :  { %v80_v23 = vld [vmem:[#allocation5 + $0x20] sm:$0xff]  ;;  %v95_v24 = vld [vmem:[#allocation5 + $0x98] sm:$0xff]  ;;  %v94_v26 = vld [vmem:[#allocation5 + $0x90] sm:$0xff] }
  0x15   :  { %956 = vmatpush.xpose.msra.mxu3 %v105_v4  ;;  %223 = vmatpush.xpose.msra.mxu1 %v105_v4  ;;  %v79_v25 = vld [vmem:[#allocation5 + $0x18] sm:$0xff]  ;;  %v78_v27 = vld [vmem:[#allocation5 + $0x10] sm:$0xff]  ;;  %v93_v28 = vld [vmem:[#allocation5 + $0x88] sm:$0xff]  ;;  %v1093_v4 = vadd.s32 128, %v1087_v0 }
  0x16   :  { %940 = vmatpush.xpose.msra.mxu2 %v89_v5  ;;  %110 = vmatpush.xpose.msra.mxu0 %v89_v5  ;;  %v77_v29 = vld [vmem:[#allocation5 + $0x8] sm:$0xff]  ;;  %v92_v30 = vld [vmem:[#allocation5 + $0x80] sm:$0xff]  ;;  %v62_v36 = vld [vmem:[#allocation2 + $0x90] sm:$0xff]  ;;  %v1060_v5 = vmov 0.0  }
  0x17   :  { %v76_v31 = vld [vmem:[#allocation5] sm:$0xff]  ;;  %v61_v34 = vld [vmem:[#allocation2 + $0x88] sm:$0xff]  ;;  %v46_v37 = vld [vmem:[#allocation2 + $0x10] sm:$0xff]  ;;  %vm471_vm1 = vcmp.eq.s32.totalorder %v419_v3, %v1093_v4 }
  0x18   :  { %v60_v32 = vld [vmem:[#allocation2 + $0x80] sm:$0xff]  ;;  %v45_v35 = vld [vmem:[#allocation2 + $0x8] sm:$0xff]  ;;  %v63_v38 = vld [vmem:[#allocation2 + $0x98] sm:$0xff] }
  0x19   :  { %957 = vmatpush.xpose.msra.mxu3 %v104_v6  ;;  %224 = vmatpush.xpose.msra.mxu1 %v104_v6  ;;  %v44_v33 = vld [vmem:[#allocation2] sm:$0xff]  ;;  %v47_v39 = vld [vmem:[#allocation2 + $0x18] sm:$0xff]  ;;  %v65_v42 = vld [vmem:[#allocation2 + $0xa8] sm:$0xff]  ;;  %v906_v6 = vsel %vm438_vm0, 1.0, %v1060_v5 }
  0x1a   :  { %941 = vmatpush.xpose.msra.mxu2 %v88_v7  ;;  %111 = vmatpush.xpose.msra.mxu0 %v88_v7  ;;  %v64_v40 = vld [vmem:[#allocation2 + $0xa0] sm:$0xff]  ;;  %v49_v43 = vld [vmem:[#allocation2 + $0x28] sm:$0xff]  ;;  %v66_v44 = vld [vmem:[#allocation2 + $0xb0] sm:$0xff]  ;;  %v404_v7 = vadd.s32 8, %v1085_v63 }
  0x1b   :  { %v48_v41 = vld [vmem:[#allocation2 + $0x20] sm:$0xff]  ;;  %v50_v45 = vld [vmem:[#allocation2 + $0x30] sm:$0xff]  ;;  %v67_v46 = vld [vmem:[#allocation2 + $0xb8] sm:$0xff] }
  0x1c   :  { %v51_v47 = vld [vmem:[#allocation2 + $0x38] sm:$0xff]  ;;  %v68_v48 = vld [vmem:[#allocation2 + $0xc0] sm:$0xff]  ;;  %v69_v50 = vld [vmem:[#allocation2 + $0xc8] sm:$0xff]  ;;  %vm440_vm2 = vcmp.eq.s32.totalorder %v404_v7, %v1087_v0 }
  0x1d   :  { %958 = vmatpush.xpose.msra.mxu3 %v103_v8  ;;  %225 = vmatpush.xpose.msra.mxu1 %v103_v8  ;;  %v52_v49 = vld [vmem:[#allocation2 + $0x40] sm:$0xff]  ;;  %v53_v51 = vld [vmem:[#allocation2 + $0x48] sm:$0xff]  ;;  %v70_v52 = vld [vmem:[#allocation2 + $0xd0] sm:$0xff]  ;;  %v694_v8 = vmul.f32 1e-06, %v906_v6 }
  0x1e   :  { %942 = vmatpush.xpose.msra.mxu2 %v87_v9  ;;  %112 = vmatpush.xpose.msra.mxu0 %v87_v9  ;;  %v54_v53 = vld [vmem:[#allocation2 + $0x50] sm:$0xff]  ;;  %v71_v54 = vld [vmem:[#allocation2 + $0xd8] sm:$0xff]  ;;  %v72_v56 = vld [vmem:[#allocation2 + $0xe0] sm:$0xff]  ;;  %v922_v9 = vsel %vm471_vm1, 1.0, %v1060_v5 }
  0x1f   :  { %v55_v55 = vld [vmem:[#allocation2 + $0x58] sm:$0xff]  ;;  %v56_v57 = vld [vmem:[#allocation2 + $0x60] sm:$0xff]  ;;  %v73_v58 = vld [vmem:[#allocation2 + $0xe8] sm:$0xff] }
  0x20   :  { %v57_v59 = vld [vmem:[#allocation2 + $0x68] sm:$0xff]  ;;  %v74_v60 = vld [vmem:[#allocation2 + $0xf0] sm:$0xff]  ;;  %v75_v1 = vld [vmem:[#allocation2 + $0xf8] sm:$0xff] }
  0x21   :  { %959 = vmatpush.xpose.msra.mxu3 %v102_v10  ;;  %226 = vmatpush.xpose.msra.mxu1 %v102_v10  ;;  %v58_v61 = vld [vmem:[#allocation2 + $0x70] sm:$0xff]  ;;  %v59_v2 = vld [vmem:[#allocation2 + $0x78] sm:$0xff] }
  0x22   :  { %943 = vmatpush.xpose.msra.mxu2 %v86_v11  ;;  %113 = vmatpush.xpose.msra.mxu0 %v86_v11 }
  0x25   :  { %960 = vmatpush.xpose.msra.mxu3 %v101_v12  ;;  %227 = vmatpush.xpose.msra.mxu1 %v101_v12  ;;  %v420_v12 = vadd.s32 136, %v1085_v63 }
  0x26   :  { %944 = vmatpush.xpose.msra.mxu2 %v85_v13  ;;  %114 = vmatpush.xpose.msra.mxu0 %v85_v13 }
  0x27   :  { %vm473_vm3 = vcmp.eq.s32.totalorder %v420_v12, %v1093_v4  ;;  %v425_v12 = vadd.s32 176, %v1085_v63 }
  0x29   :  { %961 = vmatpush.xpose.msra.mxu3 %v100_v14  ;;  %228 = vmatpush.xpose.msra.mxu1 %v100_v14  ;;  %v727_v14 = vmul.f32 1e-06, %v922_v9  ;;  %vm483_vm13 = vcmp.eq.s32.totalorder %v425_v12, %v1093_v4  ;;  %v430_v12 = vadd.s32 216, %v1085_v63 }
  0x2a   :  { %945 = vmatpush.xpose.msra.mxu2 %v84_v15  ;;  %115 = vmatpush.xpose.msra.mxu0 %v84_v15  ;;  %v907_v15 = vsel %vm440_vm2, 1.0, %v1060_v5 }
  0x2d   :  { %962 = vmatpush.xpose.msra.mxu3 %v99_v16  ;;  %229 = vmatpush.xpose.msra.mxu1 %v99_v16  ;;  %v405_v16 = vadd.s32 16, %v1085_v63 }
  0x2e   :  { %946 = vmatpush.xpose.msra.mxu2 %v83_v17  ;;  %116 = vmatpush.xpose.msra.mxu0 %v83_v17 }
  0x2f   :  { %vm442_vm4 = vcmp.eq.s32.totalorder %v405_v16, %v1087_v0  ;;  %v410_v16 = vadd.s32 56, %v1085_v63 }
  0x31   :  { %963 = vmatpush.xpose.msra.mxu3 %v98_v18  ;;  %230 = vmatpush.xpose.msra.mxu1 %v98_v18  ;;  %vm452_vm14 = vcmp.eq.s32.totalorder %v410_v16, %v1087_v0  ;;  %v415_v16 = vadd.s32 96, %v1085_v63 }
  0x32   :  { %947 = vmatpush.xpose.msra.mxu2 %v82_v19  ;;  %117 = vmatpush.xpose.msra.mxu0 %v82_v19  ;;  %v696_v19 = vmul.f32 1e-06, %v907_v15 }
  0x35   :  { %964 = vmatpush.xpose.msra.mxu3 %v97_v20  ;;  %231 = vmatpush.xpose.msra.mxu1 %v97_v20 }
  0x36   :  { %948 = vmatpush.xpose.msra.mxu2 %v81_v21  ;;  %118 = vmatpush.xpose.msra.mxu0 %v81_v21  ;;  %v923_v21 = vsel %vm473_vm3, 1.0, %v1060_v5 }
  0x39   :  { %965 = vmatpush.xpose.msra.mxu3 %v96_v22  ;;  %232 = vmatpush.xpose.msra.mxu1 %v96_v22 }
  0x3a   :  { %949 = vmatpush.xpose.msra.mxu2 %v80_v23  ;;  %119 = vmatpush.xpose.msra.mxu0 %v80_v23 }
  0x3d   :  { %966 = vmatpush.xpose.msra.mxu3 %v95_v24  ;;  %233 = vmatpush.xpose.msra.mxu1 %v95_v24  ;;  %v421_v24 = vadd.s32 144, %v1085_v63 }
  0x3e   :  { %950 = vmatpush.xpose.msra.mxu2 %v79_v25  ;;  %120 = vmatpush.xpose.msra.mxu0 %v79_v25 }
  0x3f   :  { %vm475_vm5 = vcmp.eq.s32.totalorder %v421_v24, %v1093_v4  ;;  %v426_v24 = vadd.s32 184, %v1085_v63 }
  0x41   :  { %967 = vmatpush.xpose.msra.mxu3 %v94_v26  ;;  %234 = vmatpush.xpose.msra.mxu1 %v94_v26  ;;  %v729_v26 = vmul.f32 1e-06, %v923_v21  ;;  %v928_v21 = vsel %vm483_vm13, 1.0, %v1060_v5  ;;  %vm485_vm15 = vcmp.eq.s32.totalorder %v426_v24, %v1093_v4  ;;  %v431_v24 = vadd.s32 224, %v1085_v63 }
  0x42   :  { %951 = vmatpush.xpose.msra.mxu2 %v78_v27  ;;  %121 = vmatpush.xpose.msra.mxu0 %v78_v27  ;;  %v908_v27 = vsel %vm442_vm4, 1.0, %v1060_v5 }
  0x45   :  { %968 = vmatpush.xpose.msra.mxu3 %v93_v28  ;;  %235 = vmatpush.xpose.msra.mxu1 %v93_v28  ;;  %v406_v28 = vadd.s32 24, %v1085_v63 }
  0x46   :  { %952 = vmatpush.xpose.msra.mxu2 %v77_v29  ;;  %122 = vmatpush.xpose.msra.mxu0 %v77_v29 }
  0x47   :  { %vm444_vm6 = vcmp.eq.s32.totalorder %v406_v28, %v1087_v0  ;;  %v411_v28 = vadd.s32 64, %v1085_v63 }
  0x49   :  { %969 = vmatpush.xpose.msra.mxu3 %v92_v30  ;;  %236 = vmatpush.xpose.msra.mxu1 %v92_v30  ;;  %vm454_vm0 = vcmp.eq.s32.totalorder %v411_v28, %v1087_v0  ;;  %v416_v28 = vadd.s32 104, %v1085_v63 }
  0x4a   :  { %953 = vmatpush.xpose.msra.mxu2 %v76_v31  ;;  %123 = vmatpush.xpose.msra.mxu0 %v76_v31  ;;  %v698_v31 = vmul.f32 1e-06, %v908_v27  ;;  %v913_v27 = vsel %vm452_vm14, 1.0, %v1060_v5 }
  0x4c   :  { %285 = vmatmul.f32.vlgmr.msra.gmra.mxu3 %v60_v32  ;;  %237 = vmatmul.f32.vlgmr.msra.gmra.mxu1 %v44_v33 }
  0x4d   :  { %172 = vmatmul.f32.vlgmr.msra.gmra.mxu2 %v60_v32  ;;  %124 = vmatmul.f32.vlgmr.msra.gmra.mxu0 %v44_v33  ;;  %v924_v33 = vsel %vm475_vm5, 1.0, %v1060_v5 }
  0x54   :  { %288 = vmatmul.f32.gmra.mxu3 %v61_v34  ;;  %240 = vmatmul.f32.gmra.mxu1 %v45_v35 }
  0x55   :  { %175 = vmatmul.f32.gmra.mxu2 %v61_v34  ;;  %127 = vmatmul.f32.gmra.mxu0 %v45_v35 }
  0x5c   :  { %291 = vmatmul.f32.gmra.mxu3 %v62_v36  ;;  %243 = vmatmul.f32.gmra.mxu1 %v46_v37 }
  0x5d   :  { %178 = vmatmul.f32.gmra.mxu2 %v62_v36  ;;  %130 = vmatmul.f32.gmra.mxu0 %v46_v37  ;;  %v422_v36 = vadd.s32 152, %v1085_v63 }
  0x5f   :  { %vm477_vm7 = vcmp.eq.s32.totalorder %v422_v36, %v1093_v4  ;;  %v427_v36 = vadd.s32 192, %v1085_v63 }
  0x61   :  { %vm487_vm1 = vcmp.eq.s32.totalorder %v427_v36, %v1093_v4  ;;  %v432_v36 = vadd.s32 232, %v1085_v63 }
  0x64   :  { %294 = vmatmul.f32.gmra.mxu3 %v63_v38  ;;  %246 = vmatmul.f32.gmra.mxu1 %v47_v39 }
  0x65   :  { %181 = vmatmul.f32.gmra.mxu2 %v63_v38  ;;  %133 = vmatmul.f32.gmra.mxu0 %v47_v39  ;;  %v731_v38 = vmul.f32 1e-06, %v924_v33  ;;  %v909_v39 = vsel %vm444_vm6, 1.0, %v1060_v5  ;;  %v929_v33 = vsel %vm485_vm15, 1.0, %v1060_v5 }
  0x6c   :  { %297 = vmatmul.f32.gmra.mxu3 %v64_v40  ;;  %249 = vmatmul.f32.gmra.mxu1 %v48_v41 }
  0x6d   :  { %184 = vmatmul.f32.gmra.mxu2 %v64_v40  ;;  %136 = vmatmul.f32.gmra.mxu0 %v48_v41  ;;  %v407_v40 = vadd.s32 32, %v1085_v63 }
  0x6f   :  { %vm446_vm8 = vcmp.eq.s32.totalorder %v407_v40, %v1087_v0  ;;  %v412_v40 = vadd.s32 72, %v1085_v63 }
  0x71   :  { %vm456_vm2 = vcmp.eq.s32.totalorder %v412_v40, %v1087_v0  ;;  %v417_v40 = vadd.s32 112, %v1085_v63 }
  0x74   :  { %300 = vmatmul.f32.gmra.mxu3 %v65_v42  ;;  %252 = vmatmul.f32.gmra.mxu1 %v49_v43 }
  0x75   :  { %187 = vmatmul.f32.gmra.mxu2 %v65_v42  ;;  %139 = vmatmul.f32.gmra.mxu0 %v49_v43  ;;  %v700_v43 = vmul.f32 1e-06, %v909_v39  ;;  %v914_v39 = vsel %vm454_vm0, 1.0, %v1060_v5 }
  0x7c   :  { %303 = vmatmul.f32.gmra.mxu3 %v66_v44  ;;  %255 = vmatmul.f32.gmra.mxu1 %v50_v45 }
  0x7d   :  { %190 = vmatmul.f32.gmra.mxu2 %v66_v44  ;;  %142 = vmatmul.f32.gmra.mxu0 %v50_v45  ;;  %v925_v45 = vsel %vm477_vm7, 1.0, %v1060_v5  ;;  %vm493_vm7 = vcmp.eq.s32.totalorder %v430_v12, %v1093_v4 }
  0x84   :  { %306 = vmatmul.f32.gmra.mxu3 %v67_v46  ;;  %258 = vmatmul.f32.gmra.mxu1 %v51_v47 }
  0x85   :  { %193 = vmatmul.f32.gmra.mxu2 %v67_v46  ;;  %145 = vmatmul.f32.gmra.mxu0 %v51_v47 }
  0x8c   :  { %309 = vmatmul.f32.gmra.mxu3 %v68_v48  ;;  %261 = vmatmul.f32.gmra.mxu1 %v52_v49 }
  0x8d   :  { %196 = vmatmul.f32.gmra.mxu2 %v68_v48  ;;  %148 = vmatmul.f32.gmra.mxu0 %v52_v49  ;;  %v423_v48 = vadd.s32 160, %v1085_v63 }
  0x8f   :  { %vm479_vm9 = vcmp.eq.s32.totalorder %v423_v48, %v1093_v4  ;;  %v428_v48 = vadd.s32 200, %v1085_v63 }
  0x91   :  { %vm489_vm3 = vcmp.eq.s32.totalorder %v428_v48, %v1093_v4  ;;  %v433_v48 = vadd.s32 240, %v1085_v63 }
  0x93   :  { %vm499_vm13 = vcmp.eq.s32.totalorder %v433_v48, %v1093_v4 }
  0x94   :  { %312 = vmatmul.f32.gmra.mxu3 %v69_v50  ;;  %264 = vmatmul.f32.gmra.mxu1 %v53_v51 }
  0x95   :  { %199 = vmatmul.f32.gmra.mxu2 %v69_v50  ;;  %151 = vmatmul.f32.gmra.mxu0 %v53_v51  ;;  %v733_v50 = vmul.f32 1e-06, %v925_v45  ;;  %v910_v51 = vsel %vm446_vm8, 1.0, %v1060_v5  ;;  %v930_v45 = vsel %vm487_vm1, 1.0, %v1060_v5  ;;  %vm462_vm8 = vcmp.eq.s32.totalorder %v415_v16, %v1087_v0 }
  0x9c   :  { %315 = vmatmul.f32.gmra.mxu3 %v70_v52  ;;  %267 = vmatmul.f32.gmra.mxu1 %v54_v53 }
  0x9d   :  { %202 = vmatmul.f32.gmra.mxu2 %v70_v52  ;;  %154 = vmatmul.f32.gmra.mxu0 %v54_v53  ;;  %v408_v52 = vadd.s32 40, %v1085_v63 }
  0x9f   :  { %vm448_vm10 = vcmp.eq.s32.totalorder %v408_v52, %v1087_v0  ;;  %v413_v52 = vadd.s32 80, %v1085_v63 }
  0xa1   :  { %vm458_vm4 = vcmp.eq.s32.totalorder %v413_v52, %v1087_v0  ;;  %v418_v52 = vadd.s32 120, %v1085_v63 }
  0xa3   :  { %vm468_vm14 = vcmp.eq.s32.totalorder %v418_v52, %v1087_v0 }
  0xa4   :  { %318 = vmatmul.f32.gmra.mxu3 %v71_v54  ;;  %270 = vmatmul.f32.gmra.mxu1 %v55_v55 }
  0xa5   :  { %205 = vmatmul.f32.gmra.mxu2 %v71_v54  ;;  %157 = vmatmul.f32.gmra.mxu0 %v55_v55  ;;  %v702_v55 = vmul.f32 1e-06, %v910_v51  ;;  %v915_v51 = vsel %vm456_vm2, 1.0, %v1060_v5 }
  0xac   :  { %321 = vmatmul.f32.gmra.mxu3 %v72_v56  ;;  %273 = vmatmul.f32.gmra.mxu1 %v56_v57 }
  0xad   :  { %208 = vmatmul.f32.gmra.mxu2 %v72_v56  ;;  %160 = vmatmul.f32.gmra.mxu0 %v56_v57  ;;  %v926_v57 = vsel %vm479_vm9, 1.0, %v1060_v5  ;;  %vm495_vm9 = vcmp.eq.s32.totalorder %v431_v24, %v1093_v4 }
  0xae   :  { %v735_v62 = vmul.f32 1e-06, %v926_v57  ;;  %v931_v57 = vsel %vm489_vm3, 1.0, %v1060_v5 }
  0xb4   :  { %324 = vmatmul.f32.gmra.mxu3 %v73_v58  ;;  %276 = vmatmul.f32.gmra.mxu1 %v57_v59 }
  0xb5   :  { %211 = vmatmul.f32.gmra.mxu2 %v73_v58  ;;  %163 = vmatmul.f32.gmra.mxu0 %v57_v59 }
  0xbc   :  { %327 = vmatmul.f32.gmra.mxu3 %v74_v60  ;;  %279 = vmatmul.f32.gmra.mxu1 %v58_v61 }
  0xbd   :  { %214 = vmatmul.f32.gmra.mxu2 %v74_v60  ;;  %166 = vmatmul.f32.gmra.mxu0 %v58_v61  ;;  %v424_v60 = vadd.s32 168, %v1085_v63 }
  0xbf   :  { %vm481_vm11 = vcmp.eq.s32.totalorder %v424_v60, %v1093_v4  ;;  %v429_v60 = vadd.s32 208, %v1085_v63 }
  0xc0   :  { %v927_v9 = vsel %vm481_vm11, 1.0, %v1060_v5  ;;  %vm497_vm11 = vcmp.eq.s32.totalorder %v432_v36, %v1093_v4 }
  0xc1   :  { %vm491_vm5 = vcmp.eq.s32.totalorder %v429_v60, %v1093_v4  ;;  %v434_v60 = vadd.s32 248, %v1085_v63 }
  0xc3   :  { %vm501_vm15 = vcmp.eq.s32.totalorder %v434_v60, %v1093_v4 }
  0xc4   :  { %330 = vmatmul.f32.gmra.mxu3 %v75_v1  ;;  %282 = vmatmul.f32.gmra.mxu1 %v59_v2 }
  0xc5   :  { %217 = vmatmul.f32.gmra.mxu2 %v75_v1  ;;  %169 = vmatmul.f32.gmra.mxu0 %v59_v2  ;;  %v911_v1 = vsel %vm448_vm10, 1.0, %v1060_v5  ;;  %v409_v2 = vadd.s32 48, %v1085_v63  ;;  %vm464_vm10 = vcmp.eq.s32.totalorder %v416_v28, %v1087_v0 }
  0xc6   :  { %v704_v7 = vmul.f32 1e-06, %v911_v1  ;;  %v916_v1 = vsel %vm458_vm4, 1.0, %v1060_v5 }
  0xc7   :  { %vm450_vm12 = vcmp.eq.s32.totalorder %v409_v2, %v1087_v0  ;;  %v414_v2 = vadd.s32 88, %v1085_v63 }
  0xc8   :  { %v912_v15 = vsel %vm450_vm12, 1.0, %v1060_v5  ;;  %vm466_vm12 = vcmp.eq.s32.totalorder %v417_v40, %v1087_v0 }
  0xc9   :  { %v238_v11 = vpop.f32.mrf.mxu1  ;;  %vm460_vm6 = vcmp.eq.s32.totalorder %v414_v2, %v1087_v0  ;;  %v937_v0 = vsel %vm501_vm15, 1.0, %v1060_v5 }
  0xca   :  { %v125_v10 = vpop.f32.mrf.mxu0  ;;  %823 = vst [vmem:[#allocation7 + $0x8] sm:$0xff] %v238_v11  ;;  %v757_v63 = vmul.f32 1e-06, %v937_v0 }
  0xcb   :  { %v758_v13 = vadd.f32 %v694_v8, %v125_v10 }
  0xcd   :  { %822 = vst [vmem:[#allocation7] sm:$0xff] %v758_v13 }
  0xcf   :  { %v286_v17 = vpop.f32.mrf.mxu3 }
  0xd0   :  { %v173_v18 = vpop.f32.mrf.mxu2  ;;  %v791_v20 = vadd.f32 %v727_v14, %v286_v17  ;;  %v737_v14 = vmul.f32 1e-06, %v927_v9  ;;  %v932_v9 = vsel %vm491_vm5, 1.0, %v1060_v5 }
  0xd1   :  { %854 = vst [vmem:[#allocation7 + $0x100] sm:$0xff] %v173_v18  ;;  %v241_v23 = vpop.f32.mrf.mxu1 }
  0xd2   :  { %855 = vst [vmem:[#allocation7 + $0x108] sm:$0xff] %v791_v20  ;;  %v128_v22 = vpop.f32.mrf.mxu0 }
  0xd3   :  { %v760_v25 = vadd.f32 %v696_v19, %v128_v22  ;;  %825 = vst [vmem:[#allocation7 + $0x18] sm:$0xff] %v241_v23  ;;  %v706_v19 = vmul.f32 1e-06, %v912_v15  ;;  %v917_v15 = vsel %vm460_vm6, 1.0, %v1060_v5 }
  0xd5   :  { %824 = vst [vmem:[#allocation7 + $0x10] sm:$0xff] %v760_v25 }
  0xd7   :  { %v289_v29 = vpop.f32.mrf.mxu3 }
  0xd8   :  { %v176_v30 = vpop.f32.mrf.mxu2  ;;  %v793_v32 = vadd.f32 %v729_v26, %v289_v29  ;;  %v739_v26 = vmul.f32 1e-06, %v928_v21  ;;  %v933_v21 = vsel %vm493_vm7, 1.0, %v1060_v5 }
  0xd9   :  { %856 = vst [vmem:[#allocation7 + $0x110] sm:$0xff] %v176_v30  ;;  %v244_v35 = vpop.f32.mrf.mxu1 }
  0xda   :  { %857 = vst [vmem:[#allocation7 + $0x118] sm:$0xff] %v793_v32  ;;  %v131_v34 = vpop.f32.mrf.mxu0 }
  0xdb   :  { %v762_v37 = vadd.f32 %v698_v31, %v131_v34  ;;  %827 = vst [vmem:[#allocation7 + $0x28] sm:$0xff] %v244_v35  ;;  %v708_v31 = vmul.f32 1e-06, %v913_v27  ;;  %v918_v27 = vsel %vm462_vm8, 1.0, %v1060_v5 }
  0xdd   :  { %826 = vst [vmem:[#allocation7 + $0x20] sm:$0xff] %v762_v37 }
  0xdf   :  { %v292_v41 = vpop.f32.mrf.mxu3 }
  0xe0   :  { %v179_v42 = vpop.f32.mrf.mxu2  ;;  %v795_v44 = vadd.f32 %v731_v38, %v292_v41  ;;  %v741_v38 = vmul.f32 1e-06, %v929_v33  ;;  %v934_v33 = vsel %vm495_vm9, 1.0, %v1060_v5 }
  0xe1   :  { %858 = vst [vmem:[#allocation7 + $0x120] sm:$0xff] %v179_v42  ;;  %v247_v47 = vpop.f32.mrf.mxu1 }
  0xe2   :  { %859 = vst [vmem:[#allocation7 + $0x128] sm:$0xff] %v795_v44  ;;  %v134_v46 = vpop.f32.mrf.mxu0 }
  0xe3   :  { %v764_v49 = vadd.f32 %v700_v43, %v134_v46  ;;  %829 = vst [vmem:[#allocation7 + $0x38] sm:$0xff] %v247_v47  ;;  %v710_v43 = vmul.f32 1e-06, %v914_v39  ;;  %v919_v39 = vsel %vm464_vm10, 1.0, %v1060_v5 }
  0xe5   :  { %828 = vst [vmem:[#allocation7 + $0x30] sm:$0xff] %v764_v49 }
  0xe7   :  { %v295_v53 = vpop.f32.mrf.mxu3 }
  0xe8   :  { %v182_v54 = vpop.f32.mrf.mxu2  ;;  %v797_v56 = vadd.f32 %v733_v50, %v295_v53  ;;  %v743_v50 = vmul.f32 1e-06, %v930_v45  ;;  %v935_v45 = vsel %vm497_vm11, 1.0, %v1060_v5 }
  0xe9   :  { %860 = vst [vmem:[#allocation7 + $0x130] sm:$0xff] %v182_v54  ;;  %v250_v59 = vpop.f32.mrf.mxu1 }
  0xea   :  { %861 = vst [vmem:[#allocation7 + $0x138] sm:$0xff] %v797_v56  ;;  %v137_v58 = vpop.f32.mrf.mxu0 }
  0xeb   :  { %v766_v61 = vadd.f32 %v702_v55, %v137_v58  ;;  %831 = vst [vmem:[#allocation7 + $0x48] sm:$0xff] %v250_v59  ;;  %v712_v55 = vmul.f32 1e-06, %v915_v51  ;;  %v920_v51 = vsel %vm466_vm12, 1.0, %v1060_v5 }
  0xed   :  { %830 = vst [vmem:[#allocation7 + $0x40] sm:$0xff] %v766_v61 }
  0xef   :  { %v298_v3 = vpop.f32.mrf.mxu3 }
  0xf0   :  { %v185_v6 = vpop.f32.mrf.mxu2  ;;  %v799_v8 = vadd.f32 %v735_v62, %v298_v3  ;;  %v745_v62 = vmul.f32 1e-06, %v931_v57  ;;  %v936_v57 = vsel %vm499_vm13, 1.0, %v1060_v5 }
  0xf1   :  { %862 = vst [vmem:[#allocation7 + $0x140] sm:$0xff] %v185_v6  ;;  %v253_v11 = vpop.f32.mrf.mxu1 }
  0xf2   :  { %863 = vst [vmem:[#allocation7 + $0x148] sm:$0xff] %v799_v8  ;;  %v140_v10 = vpop.f32.mrf.mxu0 }
  0xf3   :  { %v768_v13 = vadd.f32 %v704_v7, %v140_v10  ;;  %833 = vst [vmem:[#allocation7 + $0x58] sm:$0xff] %v253_v11  ;;  %v714_v7 = vmul.f32 1e-06, %v916_v1  ;;  %v921_v1 = vsel %vm468_vm14, 1.0, %v1060_v5 }
  0xf5   :  { %832 = vst [vmem:[#allocation7 + $0x50] sm:$0xff] %v768_v13 }
  0xf7   :  { %v301_v17 = vpop.f32.mrf.mxu3 }
  0xf8   :  { %v188_v18 = vpop.f32.mrf.mxu2  ;;  %v801_v20 = vadd.f32 %v737_v14, %v301_v17  ;;  %v747_v14 = vmul.f32 1e-06, %v932_v9 }
  0xf9   :  { %864 = vst [vmem:[#allocation7 + $0x150] sm:$0xff] %v188_v18  ;;  %v256_v23 = vpop.f32.mrf.mxu1 }
  0xfa   :  { %865 = vst [vmem:[#allocation7 + $0x158] sm:$0xff] %v801_v20  ;;  %v143_v22 = vpop.f32.mrf.mxu0 }
  0xfb   :  { %v770_v25 = vadd.f32 %v706_v19, %v143_v22  ;;  %835 = vst [vmem:[#allocation7 + $0x68] sm:$0xff] %v256_v23  ;;  %v716_v19 = vmul.f32 1e-06, %v917_v15 }
  0xfd   :  { %834 = vst [vmem:[#allocation7 + $0x60] sm:$0xff] %v770_v25 }
  0xff   :  { %v304_v29 = vpop.f32.mrf.mxu3 }
 0x100   :  { %v191_v30 = vpop.f32.mrf.mxu2  ;;  %v803_v32 = vadd.f32 %v739_v26, %v304_v29  ;;  %v749_v26 = vmul.f32 1e-06, %v933_v21 }
 0x101   :  { %866 = vst [vmem:[#allocation7 + $0x160] sm:$0xff] %v191_v30  ;;  %v259_v35 = vpop.f32.mrf.mxu1 }
 0x102   :  { %867 = vst [vmem:[#allocation7 + $0x168] sm:$0xff] %v803_v32  ;;  %v146_v34 = vpop.f32.mrf.mxu0 }
 0x103   :  { %v772_v37 = vadd.f32 %v708_v31, %v146_v34  ;;  %837 = vst [vmem:[#allocation7 + $0x78] sm:$0xff] %v259_v35  ;;  %v718_v31 = vmul.f32 1e-06, %v918_v27 }
 0x105   :  { %836 = vst [vmem:[#allocation7 + $0x70] sm:$0xff] %v772_v37 }
 0x107   :  { %v307_v41 = vpop.f32.mrf.mxu3 }
 0x108   :  { %v194_v42 = vpop.f32.mrf.mxu2  ;;  %v805_v44 = vadd.f32 %v741_v38, %v307_v41  ;;  %v751_v38 = vmul.f32 1e-06, %v934_v33 }
 0x109   :  { %868 = vst [vmem:[#allocation7 + $0x170] sm:$0xff] %v194_v42  ;;  %v262_v47 = vpop.f32.mrf.mxu1 }
 0x10a   :  { %869 = vst [vmem:[#allocation7 + $0x178] sm:$0xff] %v805_v44  ;;  %v149_v46 = vpop.f32.mrf.mxu0 }
 0x10b   :  { %v774_v49 = vadd.f32 %v710_v43, %v149_v46  ;;  %839 = vst [vmem:[#allocation7 + $0x88] sm:$0xff] %v262_v47  ;;  %v720_v43 = vmul.f32 1e-06, %v919_v39 }
 0x10d   :  { %838 = vst [vmem:[#allocation7 + $0x80] sm:$0xff] %v774_v49 }
 0x10f   :  { %v310_v53 = vpop.f32.mrf.mxu3 }
 0x110   :  { %v197_v54 = vpop.f32.mrf.mxu2  ;;  %v807_v56 = vadd.f32 %v743_v50, %v310_v53  ;;  %v753_v50 = vmul.f32 1e-06, %v935_v45 }
 0x111   :  { %870 = vst [vmem:[#allocation7 + $0x180] sm:$0xff] %v197_v54  ;;  %v265_v59 = vpop.f32.mrf.mxu1 }
 0x112   :  { %871 = vst [vmem:[#allocation7 + $0x188] sm:$0xff] %v807_v56  ;;  %v152_v58 = vpop.f32.mrf.mxu0 }
 0x113   :  { %v776_v61 = vadd.f32 %v712_v55, %v152_v58  ;;  %841 = vst [vmem:[#allocation7 + $0x98] sm:$0xff] %v265_v59  ;;  %v722_v55 = vmul.f32 1e-06, %v920_v51 }
 0x115   :  { %840 = vst [vmem:[#allocation7 + $0x90] sm:$0xff] %v776_v61 }
 0x117   :  { %v313_v3 = vpop.f32.mrf.mxu3 }
 0x118   :  { %v200_v6 = vpop.f32.mrf.mxu2  ;;  %v809_v8 = vadd.f32 %v745_v62, %v313_v3  ;;  %v755_v62 = vmul.f32 1e-06, %v936_v57 }
 0x119   :  { %872 = vst [vmem:[#allocation7 + $0x190] sm:$0xff] %v200_v6  ;;  %v268_v11 = vpop.f32.mrf.mxu1  ;;  %v724_v6 = vmul.f32 1e-06, %v921_v1 }
 0x11a   :  { %873 = vst [vmem:[#allocation7 + $0x198] sm:$0xff] %v809_v8  ;;  %v155_v10 = vpop.f32.mrf.mxu0 }
 0x11b   :  { %v778_v13 = vadd.f32 %v714_v7, %v155_v10  ;;  %843 = vst [vmem:[#allocation7 + $0xa8] sm:$0xff] %v268_v11 }
 0x11d   :  { %842 = vst [vmem:[#allocation7 + $0xa0] sm:$0xff] %v778_v13 }
 0x11f   :  { %v316_v17 = vpop.f32.mrf.mxu3 }
 0x120   :  { %v203_v18 = vpop.f32.mrf.mxu2  ;;  %v811_v20 = vadd.f32 %v747_v14, %v316_v17 }
 0x121   :  { %874 = vst [vmem:[#allocation7 + $0x1a0] sm:$0xff] %v203_v18  ;;  %v271_v23 = vpop.f32.mrf.mxu1 }
 0x122   :  { %875 = vst [vmem:[#allocation7 + $0x1a8] sm:$0xff] %v811_v20  ;;  %v158_v22 = vpop.f32.mrf.mxu0 }
 0x123   :  { %v780_v25 = vadd.f32 %v716_v19, %v158_v22  ;;  %845 = vst [vmem:[#allocation7 + $0xb8] sm:$0xff] %v271_v23 }
 0x125   :  { %844 = vst [vmem:[#allocation7 + $0xb0] sm:$0xff] %v780_v25 }
 0x127   :  { %v319_v29 = vpop.f32.mrf.mxu3 }
 0x128   :  { %v206_v30 = vpop.f32.mrf.mxu2  ;;  %v813_v32 = vadd.f32 %v749_v26, %v319_v29 }
 0x129   :  { %876 = vst [vmem:[#allocation7 + $0x1b0] sm:$0xff] %v206_v30  ;;  %v274_v35 = vpop.f32.mrf.mxu1 }
 0x12a   :  { %877 = vst [vmem:[#allocation7 + $0x1b8] sm:$0xff] %v813_v32  ;;  %v161_v34 = vpop.f32.mrf.mxu0 }
 0x12b   :  { %v782_v37 = vadd.f32 %v718_v31, %v161_v34  ;;  %847 = vst [vmem:[#allocation7 + $0xc8] sm:$0xff] %v274_v35 }
 0x12d   :  { %846 = vst [vmem:[#allocation7 + $0xc0] sm:$0xff] %v782_v37 }
 0x12f   :  { %v322_v41 = vpop.f32.mrf.mxu3 }
 0x130   :  { %v209_v42 = vpop.f32.mrf.mxu2  ;;  %v815_v44 = vadd.f32 %v751_v38, %v322_v41 }
 0x131   :  { %878 = vst [vmem:[#allocation7 + $0x1c0] sm:$0xff] %v209_v42  ;;  %v277_v47 = vpop.f32.mrf.mxu1 }
 0x132   :  { %879 = vst [vmem:[#allocation7 + $0x1c8] sm:$0xff] %v815_v44  ;;  %v164_v46 = vpop.f32.mrf.mxu0 }
 0x133   :  { %v784_v49 = vadd.f32 %v720_v43, %v164_v46  ;;  %849 = vst [vmem:[#allocation7 + $0xd8] sm:$0xff] %v277_v47 }
 0x135   :  { %848 = vst [vmem:[#allocation7 + $0xd0] sm:$0xff] %v784_v49 }
 0x137   :  { %v325_v53 = vpop.f32.mrf.mxu3 }
 0x138   :  { %v212_v54 = vpop.f32.mrf.mxu2  ;;  %v817_v56 = vadd.f32 %v753_v50, %v325_v53 }
 0x139   :  { %880 = vst [vmem:[#allocation7 + $0x1d0] sm:$0xff] %v212_v54  ;;  %v280_v59 = vpop.f32.mrf.mxu1 }
 0x13a   :  { %881 = vst [vmem:[#allocation7 + $0x1d8] sm:$0xff] %v817_v56  ;;  %v167_v58 = vpop.f32.mrf.mxu0 }
 0x13b   :  { %v786_v61 = vadd.f32 %v722_v55, %v167_v58  ;;  %851 = vst [vmem:[#allocation7 + $0xe8] sm:$0xff] %v280_v59 }
 0x13d   :  { %850 = vst [vmem:[#allocation7 + $0xe0] sm:$0xff] %v786_v61 }
 0x13f   :  { %v328_v2 = vpop.f32.mrf.mxu3 }
 0x140   :  { %v215_v3 = vpop.f32.mrf.mxu2  ;;  %v819_v7 = vadd.f32 %v755_v62, %v328_v2 }
 0x141   :  { %882 = vst [vmem:[#allocation7 + $0x1e0] sm:$0xff] %v215_v3  ;;  %v283_v9 = vpop.f32.mrf.mxu1 }
 0x142   :  { %883 = vst [vmem:[#allocation7 + $0x1e8] sm:$0xff] %v819_v7  ;;  %v170_v8 = vpop.f32.mrf.mxu0 }
 0x143   :  { %v788_v10 = vadd.f32 %v724_v6, %v170_v8  ;;  %853 = vst [vmem:[#allocation7 + $0xf8] sm:$0xff] %v283_v9 }
 0x145   :  { %852 = vst [vmem:[#allocation7 + $0xf0] sm:$0xff] %v788_v10 }
 0x147   :  { %v331_v4 = vpop.f32.mrf.mxu3 }
 0x148   :  { %v218_v11 = vpop.f32.mrf.mxu2  ;;  %v821_v12 = vadd.f32 %v757_v63, %v331_v4 }
 0x149   :  { %884 = vst [vmem:[#allocation7 + $0x1f0] sm:$0xff] %v218_v11 }
 0x14a   :  { %885 = vst [vmem:[#allocation7 + $0x1f8] sm:$0xff] %v821_v12 }
 0x14b   :  { %898 = dma.vmem_to_hbm [thread:$0]  %s891_s1, 8192, %s893_s23, [#allocation4], %s1062_s24, %s1062_s24, %s1063_s25  }
 0x14c   :  { %1054 = dma.done.wait [#allocation4], 8192  }
 0x14d   :  { %1055 = vsyncadd [#allocation4], 4294959104 }
 0x14e   :  { %903 = vsyncpa [#allocation3], 1 }
 0x14f   :  { %904 = vsyncpa [#allocation6], 1 }
 0x150   :  { %905 = vsyncpa [#allocation4], 1 }

</bundles_post_ra>
